<compile_context>
chip_gen: v5e
topology: v5e:2x2
jax: 0.10.0
libtpu: 0.0.40
codegen_flags: <defaults>
</compile_context>

<pallas_src>
import functools

import jax
import jax.numpy as jnp
from jax.experimental import pallas as pl
from jax.experimental.pallas import tpu as pltpu

# Problem configuration (small; channels divisible by group_num and by 2).
N, C, H, W = 2, 8, 16, 16
GROUP_NUM = 2
EPS = 1e-5            # nn.GroupNorm default eps
GATE_THRESHOLD = 0.5


def _sru_kernel(x_ref, gmat_ref, a_ref, b_ref, o_ref, *,
                c, hw, hw_pad, gate, eps):
    # x_ref : (spb, C, HWp) block (spb samples); o_ref same shape.
    # gmat_ref: (C, C) group-average matrix with 1/(Cg*HW) folded in.
    # a_ref / b_ref: (C, 1) fused per-channel gate coefficients
    #   (a = gamma * w_gamma, b = beta * w_gamma).
    gmat = gmat_ref[...]
    a = a_ref[...]
    b = b_ref[...]

    spb = x_ref.shape[0]
    for s in range(spb):                       # static unroll, spb <= 2 here
        x = x_ref[s].astype(jnp.float32)       # (C, HWp)

        # --- GroupNorm stats: mean pass, then centered variance pass -------
        s1 = jnp.sum(x, axis=-1, keepdims=True)                       # (C, 1)
        mean = jnp.dot(gmat, s1, preferred_element_type=jnp.float32)  # (C, 1)

        xc = x - mean                                                 # (C, HWp)
        if hw_pad != hw:
            # Zero the padded lanes so they don't pollute the variance.
            lane = jax.lax.broadcasted_iota(jnp.int32, xc.shape, 1)
            xc = jnp.where(lane < hw, xc, 0.0)
        ssq = jnp.sum(xc * xc, axis=-1, keepdims=True)                # (C, 1)
        var = jnp.dot(gmat, ssq, preferred_element_type=jnp.float32)  # (C, 1)

        # --- Fused gate:  sigmoid(gn_x * w_gamma) == sigmoid(xc*scale + b) --
        scale = jax.lax.rsqrt(var + eps) * a                          # (C, 1)
        rw = jax.nn.sigmoid(xc * scale + b)                           # (C, HWp)

        hi = rw > gate
        info = jnp.where(hi, 1.0, rw)
        noninfo = info - hi.astype(jnp.float32)    # == where(hi, 0, rw)

        x1 = info * x
        x2 = noninfo * x

        # --- Reconstruct: out[j] = x1[j] + x2[(j + C/2) mod C]  (roll by C/2
        # is its own inverse, so one sublane rotate + one full-tile store).
        out = x1 + pltpu.roll(x2, shift=c // 2, axis=0)
        o_ref[s, :, :] = out.astype(o_ref.dtype)


def _samples_per_block(n):
    """One block per TensorCore: fold the whole batch on single-TC chips."""
    kind = ""
    try:
        kind = jax.devices()[0].device_kind.lower()
    except Exception:
        pass
    multi_tc = ("v7" in kind) or ("v4" in kind) or ("v5p" in kind)
    spb = max(1, n // 2) if (multi_tc and n >= 2) else n
    while n % spb:                      # keep the simple exact-tiling BlockSpec
        spb -= 1
    return spb


def sr_unit(x_nchw, gn_weight, gn_bias, *, group_num=GROUP_NUM,
            gate_threshold=GATE_THRESHOLD, eps=EPS):
    n, c, h, w = x_nchw.shape
    hw = h * w
    hw_pad = ((hw + 127) // 128) * 128          # lane-dense last dim

    x2d = x_nchw.reshape(n, c, hw)
    if hw_pad != hw:
        x2d = jnp.pad(x2d, ((0, 0), (0, 0), (0, hw_pad - hw)))

    # --- Parameter glue (plain JAX, once) ---------------------------------
    # Group-average matrix with the 1/(Cg*HW) normalization folded in.
    cg = c // group_num
    ch_group = jnp.arange(c) // cg
    gmat = (ch_group[:, None] == ch_group[None, :]).astype(jnp.float32)
    gmat = gmat * (1.0 / (cg * hw))                                    # (C, C)
    # Fold GroupNorm affine and normalized-gamma gate scaling together.
    # NOTE: division by sum(gn_weight) is inherited from the PyTorch module;
    # it blows up if the learned weights sum to ~0.
    w_gamma = gn_weight / jnp.sum(gn_weight)
    a = (gn_weight * w_gamma).astype(jnp.float32)[:, None]             # (C, 1)
    b = (gn_bias * w_gamma).astype(jnp.float32)[:, None]               # (C, 1)

    spb = _samples_per_block(n)
    n_blocks = n // spb

    # Explicit VMEM budget: double-buffered in+out blocks + params, with
    # headroom for f32 temporaries; capped at 48 MiB (v7x-safe).
    io_bytes = spb * c * hw_pad * x2d.dtype.itemsize
    param_bytes = (c * c + 2 * c) * 4
    vmem_limit = int(min(48 << 20, max(8 << 20, 4 * (2 * 2 * io_bytes + param_bytes))))

    kernel = functools.partial(_sru_kernel, c=c, hw=hw, hw_pad=hw_pad,
                               gate=gate_threshold, eps=eps)

    out2d = pl.pallas_call(
        kernel,
        out_shape=jax.ShapeDtypeStruct((n, c, hw_pad), x_nchw.dtype),
        grid_spec=pltpu.PrefetchScalarGridSpec(
            num_scalar_prefetch=0,
            grid=(n_blocks,),
            in_specs=[
                pl.BlockSpec((spb, c, hw_pad), lambda i: (i, 0, 0)),  # x block
                pl.BlockSpec((c, c), lambda i: (0, 0)),               # gmat
                pl.BlockSpec((c, 1), lambda i: (0, 0)),               # a
                pl.BlockSpec((c, 1), lambda i: (0, 0)),               # b
            ],
            out_specs=pl.BlockSpec((spb, c, hw_pad), lambda i: (i, 0, 0)),
        ),
        compiler_params=pltpu.CompilerParams(
            dimension_semantics=("parallel",),
            vmem_limit_bytes=vmem_limit),
    )(x2d, gmat, a, b)

    if hw_pad != hw:
        out2d = out2d[:, :, :hw]
    return out2d.reshape(n, c, h, w)


def sr_unit_ref(x, gn_weight, gn_bias, *, group_num=GROUP_NUM,
                gate_threshold=GATE_THRESHOLD, eps=EPS):
    """Pure-JAX reference mirroring the PyTorch module (torch_gn=True)."""
    n, c, h, w = x.shape
    xg = x.reshape(n, group_num, -1)
    mean = jnp.mean(xg, axis=2, keepdims=True)
    var = jnp.mean((xg - mean) ** 2, axis=2, keepdims=True)
    xn = ((xg - mean) / jnp.sqrt(var + eps)).reshape(n, c, h, w)
    gn_x = xn * gn_weight.reshape(1, c, 1, 1) + gn_bias.reshape(1, c, 1, 1)
    w_gamma = (gn_weight / jnp.sum(gn_weight)).reshape(1, c, 1, 1)
    rw = jax.nn.sigmoid(gn_x * w_gamma)
    info = jnp.where(rw > gate_threshold, jnp.ones_like(rw), rw)
    noninfo = jnp.where(rw > gate_threshold, jnp.zeros_like(rw), rw)
    x1, x2 = info * x, noninfo * x
    half = c // 2
    return jnp.concatenate(
        [x1[:, :half] + x2[:, half:], x1[:, half:] + x2[:, :half]], axis=1)


if __name__ == "__main__":
    key = jax.random.PRNGKey(0)
    kx, kw, kb = jax.random.split(key, 3)

    # Deterministic synthetic parameters (nn.GroupNorm holds weight (C,), bias (C,)).
    x = jax.random.normal(kx, (N, C, H, W), dtype=jnp.float32)
    gn_weight = jax.random.normal(kw, (C,), dtype=jnp.float32) * 0.5 + 1.0
    gn_bias = jax.random.normal(kb, (C,), dtype=jnp.float32) * 0.1

    out = sr_unit(x, gn_weight, gn_bias)
    out = jax.block_until_ready(out)

    ref = sr_unit_ref(x, gn_weight, gn_bias)
    assert out.shape == (N, C, H, W)
    assert jnp.allclose(out, ref, atol=1e-4, rtol=1e-4), (
        f"max abs err {jnp.max(jnp.abs(out - ref))}")

    print("KERNEL_OK")
</pallas_src>

<mosaic_0001>
module attributes {stable_mosaic.version = 11 : i64} {
  func.func @_sru_kernel(%arg0: i32, %arg1: memref<2x8x256xf32, #tpu.memory_space<vmem>>, %arg2: memref<8x8xf32, #tpu.memory_space<vmem>>, %arg3: memref<8x1xf32, #tpu.memory_space<vmem>>, %arg4: memref<8x1xf32, #tpu.memory_space<vmem>>, %arg5: memref<2x8x256xf32, #tpu.memory_space<vmem>>) attributes {dimension_semantics = [#tpu.dimension_semantics<parallel>], iteration_bounds = array<i64: 1>, scalar_prefetch = 0 : i64, scratch_operands = 0 : i64, tpu.core_type = #tpu.core_type<tc>, window_params = [{transform_indices = @transform_0, window_bounds = array<i64: 2, 8, 256>}, {pipeline_mode = #tpu.pipeline_mode<synchronous>, transform_indices = @transform_1, window_bounds = array<i64: 8, 8>}, {pipeline_mode = #tpu.pipeline_mode<synchronous>, transform_indices = @transform_2, window_bounds = array<i64: 8, 1>}, {pipeline_mode = #tpu.pipeline_mode<synchronous>, transform_indices = @transform_3, window_bounds = array<i64: 8, 1>}, {transform_indices = @transform_4, window_bounds = array<i64: 2, 8, 256>}]} {
    %c0 = arith.constant 0 : index
    %c0_0 = arith.constant 0 : index
    %0 = vector.load %arg2[%c0, %c0_0] : memref<8x8xf32, #tpu.memory_space<vmem>>, vector<8x8xf32>
    %c0_1 = arith.constant 0 : index
    %c0_2 = arith.constant 0 : index
    %1 = vector.load %arg3[%c0_1, %c0_2] : memref<8x1xf32, #tpu.memory_space<vmem>>, vector<8x1xf32>
    %c0_3 = arith.constant 0 : index
    %c0_4 = arith.constant 0 : index
    %2 = vector.load %arg4[%c0_3, %c0_4] : memref<8x1xf32, #tpu.memory_space<vmem>>, vector<8x1xf32>
    %c0_5 = arith.constant 0 : index
    %c0_6 = arith.constant 0 : index
    %c0_7 = arith.constant 0 : index
    %3 = vector.load %arg1[%c0_5, %c0_6, %c0_7] : memref<2x8x256xf32, #tpu.memory_space<vmem>>, vector<1x8x256xf32>
    %4 = vector.shape_cast %3 : vector<1x8x256xf32> to vector<8x256xf32>
    %cst = arith.constant dense<0.000000e+00> : vector<8xf32>
    %5 = vector.multi_reduction <add>, %4, %cst [1] : vector<8x256xf32> to vector<8xf32>
    %6 = vector.shape_cast %5 : vector<8xf32> to vector<8x1xf32>
    %cst_8 = arith.constant dense<0.000000e+00> : vector<8x1xf32>
    %7 = tpu.matmul %0, %6, %cst_8 {dimension_numbers = #tpu.dot_dimension_numbers<[1], [0], [0], [1], [0, 0, 1, 1], [], []>} : vector<8x8xf32>, vector<8x1xf32>, vector<8x1xf32> -> vector<8x1xf32>
    %8 = vector.broadcast %7 : vector<8x1xf32> to vector<8x256xf32>
    %9 = arith.subf %4, %8 : vector<8x256xf32>
    %10 = arith.mulf %9, %9 : vector<8x256xf32>
    %cst_9 = arith.constant dense<0.000000e+00> : vector<8xf32>
    %11 = vector.multi_reduction <add>, %10, %cst_9 [1] : vector<8x256xf32> to vector<8xf32>
    %12 = vector.shape_cast %11 : vector<8xf32> to vector<8x1xf32>
    %cst_10 = arith.constant dense<0.000000e+00> : vector<8x1xf32>
    %13 = tpu.matmul %0, %12, %cst_10 {dimension_numbers = #tpu.dot_dimension_numbers<[1], [0], [0], [1], [0, 0, 1, 1], [], []>} : vector<8x8xf32>, vector<8x1xf32>, vector<8x1xf32> -> vector<8x1xf32>
    %cst_11 = arith.constant 9.99999974E-6 : f32
    %14 = vector.broadcast %cst_11 : f32 to vector<8x1xf32>
    %15 = arith.addf %13, %14 : vector<8x1xf32>
    %16 = math.rsqrt %15 : vector<8x1xf32>
    %17 = arith.mulf %16, %1 : vector<8x1xf32>
    %18 = vector.broadcast %17 : vector<8x1xf32> to vector<8x256xf32>
    %19 = arith.mulf %9, %18 : vector<8x256xf32>
    %20 = vector.broadcast %2 : vector<8x1xf32> to vector<8x256xf32>
    %21 = arith.addf %19, %20 : vector<8x256xf32>
    %22 = arith.negf %21 : vector<8x256xf32>
    %23 = math.exp %22 : vector<8x256xf32>
    %cst_12 = arith.constant 1.000000e+00 : f32
    %24 = vector.broadcast %cst_12 : f32 to vector<8x256xf32>
    %25 = arith.addf %24, %23 : vector<8x256xf32>
    %26 = arith.divf %24, %25 : vector<8x256xf32>
    %cst_13 = arith.constant 5.000000e-01 : f32
    %27 = vector.broadcast %cst_13 : f32 to vector<8x256xf32>
    %28 = arith.cmpf ogt, %26, %27 : vector<8x256xf32>
    %cst_14 = arith.constant 1.000000e+00 : f32
    %29 = vector.broadcast %cst_14 : f32 to vector<8x256xf32>
    %30 = arith.select %28, %29, %26 : vector<8x256xi1>, vector<8x256xf32>
    %31 = arith.extui %28 : vector<8x256xi1> to vector<8x256xi32>
    %32 = arith.sitofp %31 : vector<8x256xi32> to vector<8x256xf32>
    %33 = arith.subf %30, %32 : vector<8x256xf32>
    %34 = arith.mulf %30, %4 : vector<8x256xf32>
    %35 = arith.mulf %33, %4 : vector<8x256xf32>
    %c4_i32 = arith.constant 4 : i32
    %36 = tpu.dynamic_rotate %35 by %c4_i32 dim 0 : vector<8x256xf32>, i32 -> vector<8x256xf32>
    %37 = arith.addf %34, %36 : vector<8x256xf32>
    %c0_15 = arith.constant 0 : index
    %c0_16 = arith.constant 0 : index
    %c0_17 = arith.constant 0 : index
    %38 = vector.load %arg5[%c0_15, %c0_16, %c0_17] : memref<2x8x256xf32, #tpu.memory_space<vmem>>, vector<1x8x256xf32>
    %39 = vector.shape_cast %38 : vector<1x8x256xf32> to vector<8x256xf32>
    %40 = vector.shape_cast %37 : vector<8x256xf32> to vector<1x8x256xf32>
    tpu.vector_store %arg5[%c0_15, %c0_16, %c0_17], %40 {strides = array<i32>} : memref<2x8x256xf32, #tpu.memory_space<vmem>>, vector<1x8x256xf32>,
    %c1 = arith.constant 1 : index
    %c0_18 = arith.constant 0 : index
    %c0_19 = arith.constant 0 : index
    %41 = vector.load %arg1[%c1, %c0_18, %c0_19] : memref<2x8x256xf32, #tpu.memory_space<vmem>>, vector<1x8x256xf32>
    %42 = vector.shape_cast %41 : vector<1x8x256xf32> to vector<8x256xf32>
    %cst_20 = arith.constant dense<0.000000e+00> : vector<8xf32>
    %43 = vector.multi_reduction <add>, %42, %cst_20 [1] : vector<8x256xf32> to vector<8xf32>
    %44 = vector.shape_cast %43 : vector<8xf32> to vector<8x1xf32>
    %cst_21 = arith.constant dense<0.000000e+00> : vector<8x1xf32>
    %45 = tpu.matmul %0, %44, %cst_21 {dimension_numbers = #tpu.dot_dimension_numbers<[1], [0], [0], [1], [0, 0, 1, 1], [], []>} : vector<8x8xf32>, vector<8x1xf32>, vector<8x1xf32> -> vector<8x1xf32>
    %46 = vector.broadcast %45 : vector<8x1xf32> to vector<8x256xf32>
    %47 = arith.subf %42, %46 : vector<8x256xf32>
    %48 = arith.mulf %47, %47 : vector<8x256xf32>
    %cst_22 = arith.constant dense<0.000000e+00> : vector<8xf32>
    %49 = vector.multi_reduction <add>, %48, %cst_22 [1] : vector<8x256xf32> to vector<8xf32>
    %50 = vector.shape_cast %49 : vector<8xf32> to vector<8x1xf32>
    %cst_23 = arith.constant dense<0.000000e+00> : vector<8x1xf32>
    %51 = tpu.matmul %0, %50, %cst_23 {dimension_numbers = #tpu.dot_dimension_numbers<[1], [0], [0], [1], [0, 0, 1, 1], [], []>} : vector<8x8xf32>, vector<8x1xf32>, vector<8x1xf32> -> vector<8x1xf32>
    %cst_24 = arith.constant 9.99999974E-6 : f32
    %52 = vector.broadcast %cst_24 : f32 to vector<8x1xf32>
    %53 = arith.addf %51, %52 : vector<8x1xf32>
    %54 = math.rsqrt %53 : vector<8x1xf32>
    %55 = arith.mulf %54, %1 : vector<8x1xf32>
    %56 = vector.broadcast %55 : vector<8x1xf32> to vector<8x256xf32>
    %57 = arith.mulf %47, %56 : vector<8x256xf32>
    %58 = vector.broadcast %2 : vector<8x1xf32> to vector<8x256xf32>
    %59 = arith.addf %57, %58 : vector<8x256xf32>
    %60 = arith.negf %59 : vector<8x256xf32>
    %61 = math.exp %60 : vector<8x256xf32>
    %cst_25 = arith.constant 1.000000e+00 : f32
    %62 = vector.broadcast %cst_25 : f32 to vector<8x256xf32>
    %63 = arith.addf %62, %61 : vector<8x256xf32>
    %64 = arith.divf %62, %63 : vector<8x256xf32>
    %cst_26 = arith.constant 5.000000e-01 : f32
    %65 = vector.broadcast %cst_26 : f32 to vector<8x256xf32>
    %66 = arith.cmpf ogt, %64, %65 : vector<8x256xf32>
    %cst_27 = arith.constant 1.000000e+00 : f32
    %67 = vector.broadcast %cst_27 : f32 to vector<8x256xf32>
    %68 = arith.select %66, %67, %64 : vector<8x256xi1>, vector<8x256xf32>
    %69 = arith.extui %66 : vector<8x256xi1> to vector<8x256xi32>
    %70 = arith.sitofp %69 : vector<8x256xi32> to vector<8x256xf32>
    %71 = arith.subf %68, %70 : vector<8x256xf32>
    %72 = arith.mulf %68, %42 : vector<8x256xf32>
    %73 = arith.mulf %71, %42 : vector<8x256xf32>
    %c4_i32_28 = arith.constant 4 : i32
    %74 = tpu.dynamic_rotate %73 by %c4_i32_28 dim 0 : vector<8x256xf32>, i32 -> vector<8x256xf32>
    %75 = arith.addf %72, %74 : vector<8x256xf32>
    %c1_29 = arith.constant 1 : index
    %c0_30 = arith.constant 0 : index
    %c0_31 = arith.constant 0 : index
    %76 = vector.load %arg5[%c1_29, %c0_30, %c0_31] : memref<2x8x256xf32, #tpu.memory_space<vmem>>, vector<1x8x256xf32>
    %77 = vector.shape_cast %76 : vector<1x8x256xf32> to vector<8x256xf32>
    %78 = vector.shape_cast %75 : vector<8x256xf32> to vector<1x8x256xf32>
    tpu.vector_store %arg5[%c1_29, %c0_30, %c0_31], %78 {strides = array<i32>} : memref<2x8x256xf32, #tpu.memory_space<vmem>>, vector<1x8x256xf32>,
    return
  }
  func.func @transform_0(%arg0: i32) -> (i32, i32, i32) {
    %c0_i32 = arith.constant 0 : i32
    %c0_i32_0 = arith.constant 0 : i32
    %c0_i32_1 = arith.constant 0 : i32
    return %arg0, %c0_i32, %c0_i32_0 : i32, i32, i32
  }
  func.func @transform_1(%arg0: i32) -> (i32, i32) {
    %c0_i32 = arith.constant 0 : i32
    %c0_i32_0 = arith.constant 0 : i32
    %c0_i32_1 = arith.constant 0 : i32
    return %c0_i32, %c0_i32_0 : i32, i32
  }
  func.func @transform_2(%arg0: i32) -> (i32, i32) {
    %c0_i32 = arith.constant 0 : i32
    %c0_i32_0 = arith.constant 0 : i32
    %c0_i32_1 = arith.constant 0 : i32
    return %c0_i32, %c0_i32_0 : i32, i32
  }
  func.func @transform_3(%arg0: i32) -> (i32, i32) {
    %c0_i32 = arith.constant 0 : i32
    %c0_i32_0 = arith.constant 0 : i32
    %c0_i32_1 = arith.constant 0 : i32
    return %c0_i32, %c0_i32_0 : i32, i32
  }
  func.func @transform_4(%arg0: i32) -> (i32, i32, i32) {
    %c0_i32 = arith.constant 0 : i32
    %c0_i32_0 = arith.constant 0 : i32
    %c0_i32_1 = arith.constant 0 : i32
    return %arg0, %c0_i32, %c0_i32_0 : i32, i32, i32
  }
}

</mosaic_0001>

<bundles_post_ra>
// kernel: tpu_custom_call.1
= control target key start
LH: loop header
LB: loop body
LE: loop exit
PB: predicated region body
PF: predicated region fallthrough
CT: control target
= control target key end

     0   :  { %9 = vsyncpa [#allocation3], 0  ;;  %s526_s0 = inlined_call_operand.hbm [shape: f32[2,8,256], index: 0, kind: input, shape index: {}]   ;;  %s527_s1 = inlined_call_operand.vmem [shape: f32[8,8], index: 1, kind: input, shape index: {}]   ;;  %s528_s2 = inlined_call_operand.vmem [shape: f32[8,1], index: 2, kind: input, shape index: {}]   ;;  %s529_s3 = inlined_call_operand.vmem [shape: f32[8,1], index: 3, kind: input, shape index: {}]   ;;  %s530_s4 = inlined_call_operand.hbm [shape: f32[2,8,256], index: 4, kind: output, shape index: {}]  }
   0x1   :  { %10 = vsyncpa [#allocation4], 0  ;;  %s15_s17 = sshll.u32 %s526_s0, 4  ;;  %s430_s18 = smov [#allocation2]   ;;  %s16_s17 = int_to_ptr.hbm [resolvable:$true] %s15_s17 }
   0x2   :  { %s17_s19 = sshll.u32 %s430_s18, 4  ;;  %s431_s20 = smov 256   ;;  %s18_s19 = int_to_ptr.vmem [resolvable:$true] %s17_s19 }
   0x3   :  { %s432_s21 = smov 16  }
   0x4   :  { %23 = dma.hbm_to_vmem [thread:$0]  %s16_s17, 512, %s18_s19, [#allocation3], %s431_s20, %s431_s20, %s432_s21  }
   0x5   :  { %426 = dma.done.wait [#allocation3], 512  }
   0x6   :  { %427 = vsyncadd [#allocation3], 4294966784  ;;  %v467_v0 = vld [vmem:[#allocation2 + $0x10] sm:$0xff]  ;;  %v469_v1 = vld [vmem:[#allocation2 + $0x18] sm:$0xff]  ;;  %v433_v6 = vmov 0   ;;  %vm42_vm0 = vcmask 64512  }
   0x7   :  { %v184_v2 = vadd.f32 %v469_v1, %v467_v0  ;;  %v473_v3 = vld [vmem:[#allocation2] sm:$0xff]  ;;  %v475_v4 = vld [vmem:[#allocation2 + $0x8] sm:$0xff]  ;;  %355 = vset.pattern.permute.xlu1 %v433_v6  ;;  %356 = vset.pattern.permute.xlu0 %v433_v6  ;;  %s324_s28 = sshll.u32 %s530_s4, 4  ;;  %s325_s28 = int_to_ptr.hbm [resolvable:$true] %s324_s28 }
   0x8   :  { %v39_v5 = vadd.f32 %v475_v4, %v473_v3  ;;  %357 = vset.pattern.permute.xlu2 %v433_v6  ;;  %v34_v7 = vld [vmem:[%s527_s1] sm:$0xff] }
   0x9   :  { %185 = vadd.xlane.f32.xlu0 %v184_v2  ;;  %v36_v26 = vld [vmem:[%s529_s3] sm:$0xff] }
   0xa   :  { %v35_v42 = vld [vmem:[%s528_s2] sm:$0xff]  ;;  %s435_s2 = smov [#allocation5]  }
   0xb   :  { %s322_s25 = sshll.u32 %s435_s2, 4  ;;  %s323_s25 = int_to_ptr.vmem [resolvable:$true] %s322_s25 }
  0x11   :  { %40 = vadd.xlane.f32.xlu0 %v39_v5 }
  0x7c   :  { %v186_v8 = vpop.xlane.xlu0 %185 }
  0x7d   :  { %202 = vmatpush.msra.mxu2 %v186_v8 }
  0x7e   :  { %343 = vmatmul.msk.f32.vlgmr.msra.gmra.mxu2 %vm42_vm0, %v34_v7 }
  0x84   :  { %v41_v9 = vpop.xlane.xlu0 %40 }
  0x85   :  { %61 = vmatpush.msra.mxu0 %v41_v9 }
  0x86   :  { %337 = vmatmul.msk.f32.vlgmr.msra.gmra.mxu0 %vm42_vm0, %v34_v7 }
 0x101   :  { %v204_v10 = vpop.f32.mrf.mxu2 }
 0x102   :  { %209 = vperm.xlu1 %355, %v204_v10  }
 0x103   :  { %v63_v11 = vpop.f32.mrf.mxu0 }
 0x10a   :  { %68 = vperm.xlu1 %355, %v63_v11  }
 0x174   :  { %v210_v12 = vpop.permute.xlu1 %209 }
 0x175   :  { %v212_v13 = vsub.f32 %v467_v0, %v210_v12  ;;  %v213_v14 = vsub.f32 %v469_v1, %v210_v12 }
 0x177   :  { %v214_v15 = vmul.f32 %v212_v13, %v212_v13  ;;  %v215_v16 = vmul.f32 %v213_v14, %v213_v14 }
 0x179   :  { %v216_v17 = vadd.f32 %v215_v16, %v214_v15 }
 0x17b   :  { %217 = vadd.xlane.f32.xlu2 %v216_v17 }
 0x17c   :  { %v69_v18 = vpop.permute.xlu1 %68 }
 0x17d   :  { %v71_v19 = vsub.f32 %v473_v3, %v69_v18  ;;  %v72_v20 = vsub.f32 %v475_v4, %v69_v18 }
 0x17f   :  { %v73_v21 = vmul.f32 %v71_v19, %v71_v19  ;;  %v74_v22 = vmul.f32 %v72_v20, %v72_v20 }
 0x181   :  { %v75_v23 = vadd.f32 %v74_v22, %v73_v21 }
 0x183   :  { %76 = vadd.xlane.f32.xlu2 %v75_v23 }
 0x19b   :  { %118 = vperm.xlu2 %357, %v36_v26  }
 0x1ee   :  { %v218_v24 = vpop.xlane.xlu2 %217 }
 0x1ef   :  { %234 = vmatpush.msra.mxu3 %v218_v24 }
 0x1f0   :  { %344 = vmatmul.msk.f32.vlgmr.msra.gmra.mxu3 %vm42_vm0, %v34_v7 }
 0x1f6   :  { %v77_v25 = vpop.xlane.xlu2 %76 }
 0x1f7   :  { %93 = vmatpush.msra.mxu1 %v77_v25 }
 0x1f8   :  { %338 = vmatmul.msk.f32.vlgmr.msra.gmra.mxu1 %vm42_vm0, %v34_v7 }
 0x1fe   :  { %v119_v49 = vpop.permute.xlu2 %118 }
 0x273   :  { %v236_v27 = vpop.f32.mrf.mxu3 }
 0x274   :  { %v237_v28 = vadd.f32 1e-05, %v236_v27 }
 0x275   :  { %v95_v29 = vpop.f32.mrf.mxu1 }
 0x276   :  { %358 = vrsqrt.f32 %v237_v28  ;;  %v96_v30 = vadd.f32 1e-05, %v95_v29  ;;  %vm245_vm2 = vweird.f32 %v237_v28 }
 0x278   :  { %360 = vrsqrt.f32 %v96_v30  ;;  %vm104_vm5 = vweird.f32 %v96_v30 }
 0x27c   :  { %v359_v31 = vpop.eup %358 }
 0x27d   :  { %v240_v32 = vmul.f32 %v359_v31, %v237_v28  ;;  %vm246_vm1 = vweird.f32 %v359_v31 }
 0x27e   :  { %v361_v33 = vpop.eup %360  ;;  %vm247_vm4 = vmor %vm245_vm2, %vm246_vm1 }
 0x27f   :  { %v241_v34 = vmul.f32 %v359_v31, %v240_v32  ;;  %v99_v35 = vmul.f32 %v361_v33, %v96_v30  ;;  %vm105_vm3 = vweird.f32 %v361_v33 }
 0x280   :  { %vm106_vm6 = vmor %vm104_vm5, %vm105_vm3 }
 0x281   :  { %v242_v36 = vmul.f32 0.5, %v241_v34  ;;  %v100_v37 = vmul.f32 %v361_v33, %v99_v35 }
 0x283   :  { %v243_v38 = vsub.f32 1.5, %v242_v36  ;;  %v101_v39 = vmul.f32 0.5, %v100_v37 }
 0x285   :  { %v244_v40 = vmul.f32 %v359_v31, %v243_v38  ;;  %v102_v41 = vsub.f32 1.5, %v101_v39 }
 0x287   :  { %v103_v43 = vmul.f32 %v361_v33, %v102_v41  ;;  %v248_v44 = vsel %vm247_vm4, %v359_v31, %v244_v40 }
 0x288   :  { %v249_v45 = vmul.f32 %v248_v44, %v35_v42 }
 0x289   :  { %v107_v46 = vsel %vm106_vm6, %v361_v33, %v103_v43 }
 0x28a   :  { %252 = vperm.xlu1 %355, %v249_v45   ;;  %v108_v47 = vmul.f32 %v107_v46, %v35_v42 }
 0x28c   :  { %111 = vperm.xlu0 %356, %v108_v47  }
 0x2fc   :  { %v253_v48 = vpop.permute.xlu1 %252 }
 0x2fd   :  { %v255_v50 = vmul.f32 %v253_v48, %v212_v13  ;;  %v256_v51 = vmul.f32 %v253_v48, %v213_v14 }
 0x2fe   :  { %v112_v52 = vpop.permute.xlu0 %111 }
 0x2ff   :  { %v114_v53 = vmul.f32 %v112_v52, %v71_v19  ;;  %v115_v54 = vmul.f32 %v112_v52, %v72_v20  ;;  %v257_v55 = vadd.f32 %v255_v50, %v119_v49  ;;  %v258_v56 = vadd.f32 %v256_v51, %v119_v49 }
 0x301   :  { %v121_v57 = vadd.f32 %v119_v49, %v114_v53  ;;  %v122_v58 = vadd.f32 %v119_v49, %v115_v54  ;;  %v345_v59 = vmul.f32 -1.442695, %v257_v55  ;;  %v346_v60 = vmul.f32 -1.442695, %v258_v56 }
 0x302   :  { %v434_v55 = vmov 0.0  }
 0x303   :  { %v339_v61 = vmul.f32 -1.442695, %v121_v57  ;;  %v340_v62 = vmul.f32 -1.442695, %v122_v58  ;;  %362 = vpow2.f32 %v345_v59 }
 0x304   :  { %364 = vpow2.f32 %v346_v60 }
 0x305   :  { %366 = vpow2.f32 %v339_v61 }
 0x306   :  { %368 = vpow2.f32 %v340_v62 }
 0x309   :  { %v363_v63 = vpop.eup %362 }
 0x30a   :  { %v365_v2 = vpop.eup %364  ;;  %v265_v5 = vadd.f32 1.0, %v363_v63 }
 0x30b   :  { %v367_v6 = vpop.eup %366  ;;  %v266_v7 = vadd.f32 1.0, %v365_v2 }
 0x30c   :  { %v369_v8 = vpop.eup %368  ;;  %v129_v9 = vadd.f32 1.0, %v367_v6  ;;  %370 = vrcp.f32 %v265_v5  ;;  %vm272_vm7 = vweird.f32 %v265_v5  ;;  %v276_v16 = vand.u32 2147483647, %v265_v5 }
 0x30d   :  { %v130_v10 = vadd.f32 1.0, %v369_v8  ;;  %372 = vrcp.f32 %v266_v7  ;;  %v278_v17 = vand.u32 2147483648, %v265_v5  ;;  %vm287_vm10 = vweird.f32 %v266_v7 }
 0x30e   :  { %374 = vrcp.f32 %v129_v9  ;;  %v140_v12 = vand.u32 2147483647, %v129_v9  ;;  %v142_v13 = vand.u32 2147483648, %v129_v9  ;;  %vm136_vm8 = vweird.f32 %v129_v9 }
 0x30f   :  { %376 = vrcp.f32 %v130_v10  ;;  %vm151_vm9 = vweird.f32 %v130_v10  ;;  %v155_v22 = vand.u32 2147483647, %v130_v10  ;;  %v157_v23 = vand.u32 2147483648, %v130_v10 }
 0x310   :  { %vm496_vm11 = vcmp.eq.f32.partialorder %v140_v12, 8.507059e+37  ;;  %v143_v26 = vor.u32 1.1754944e-38, %v142_v13  ;;  %v293_v31 = vand.u32 2147483648, %v266_v7  ;;  %v291_v34 = vand.u32 2147483647, %v266_v7 }
 0x311   :  { %vm277_vm15 = vcmp.eq.f32.partialorder %v276_v16, 8.507059e+37  ;;  %v279_v38 = vor.u32 1.1754944e-38, %v278_v17  ;;  %vm501_vm2 = vcmp.eq.f32.partialorder %v155_v22, 8.507059e+37  ;;  %v158_v47 = vor.u32 1.1754944e-38, %v157_v23 }
 0x312   :  { %v371_v11 = vpop.eup %370  ;;  %v294_v42 = vor.u32 1.1754944e-38, %v293_v31  ;;  %vm292_vm5 = vcmp.eq.f32.partialorder %v291_v34, 8.507059e+37 }
 0x313   :  { %v373_v14 = vpop.eup %372  ;;  %v268_v15 = vmul.f32 %v371_v11, %v265_v5  ;;  %vm273_vm12 = vweird.f32 %v371_v11 }
 0x314   :  { %v375_v18 = vpop.eup %374  ;;  %v283_v19 = vmul.f32 %v373_v14, %v266_v7  ;;  %vm288_vm13 = vweird.f32 %v373_v14  ;;  %vm274_vm1 = vmor %vm272_vm7, %vm273_vm12 }
 0x315   :  { %v377_v20 = vpop.eup %376  ;;  %v132_v21 = vmul.f32 %v375_v18, %v129_v9  ;;  %v269_v24 = vsub.f32 1.0, %v268_v15  ;;  %vm137_vm14 = vweird.f32 %v375_v18  ;;  %vm289_vm3 = vmor %vm287_vm10, %vm288_vm13 }
 0x316   :  { %v147_v27 = vmul.f32 %v377_v20, %v130_v10  ;;  %v284_v28 = vsub.f32 1.0, %v283_v19  ;;  %vm152_vm0 = vweird.f32 %v377_v20  ;;  %vm138_vm4 = vmor %vm136_vm8, %vm137_vm14 }
 0x317   :  { %v133_v29 = vsub.f32 1.0, %v132_v21  ;;  %v270_v30 = vmul.f32 %v371_v11, %v269_v24  ;;  %vm153_vm6 = vmor %vm151_vm9, %vm152_vm0 }
 0x318   :  { %v148_v32 = vsub.f32 1.0, %v147_v27  ;;  %v285_v33 = vmul.f32 %v373_v14, %v284_v28 }
 0x319   :  { %v134_v35 = vmul.f32 %v375_v18, %v133_v29  ;;  %v271_v36 = vadd.f32 %v371_v11, %v270_v30 }
 0x31a   :  { %v149_v37 = vmul.f32 %v377_v20, %v148_v32  ;;  %v286_v39 = vadd.f32 %v373_v14, %v285_v33 }
 0x31b   :  { %v135_v40 = vadd.f32 %v375_v18, %v134_v35  ;;  %v275_v43 = vsel %vm274_vm1, %v371_v11, %v271_v36 }
 0x31c   :  { %v150_v44 = vadd.f32 %v377_v20, %v149_v37  ;;  %v280_v45 = vsel %vm277_vm15, %v279_v38, %v275_v43  ;;  %v290_v46 = vsel %vm289_vm3, %v373_v14, %v286_v39 }
 0x31d   :  { %v139_v48 = vsel %vm138_vm4, %v375_v18, %v135_v40  ;;  %v295_v49 = vsel %vm292_vm5, %v294_v42, %v290_v46  ;;  %vm297_vm7 = vcmp.gt.f32.partialorder %v280_v45, 0.5 }
 0x31e   :  { %v144_v50 = vsel %vm496_vm11, %v143_v26, %v139_v48  ;;  %v154_v51 = vsel %vm153_vm6, %v377_v20, %v150_v44  ;;  %vm298_vm12 = vcmp.gt.f32.partialorder %v295_v49, 0.5  ;;  %v299_v52 = vsel %vm297_vm7, 1.0, %v280_v45 }
 0x31f   :  { %v159_v53 = vsel %vm501_vm2, %v158_v47, %v154_v51  ;;  %vm161_vm8 = vcmp.gt.f32.partialorder %v144_v50, 0.5  ;;  %v300_v54 = vsel %vm298_vm12, 1.0, %v295_v49  ;;  %v347_v56 = vsel %vm297_vm7, 1.0, %v434_v55 }
 0x320   :  { %vm162_vm10 = vcmp.gt.f32.partialorder %v159_v53, 0.5  ;;  %v163_v57 = vsel %vm161_vm8, 1.0, %v144_v50  ;;  %v341_v58 = vsel %vm161_vm8, 1.0, %v434_v55  ;;  %v348_v59 = vsel %vm298_vm12, 1.0, %v434_v55 }
 0x321   :  { %v164_v60 = vsel %vm162_vm10, 1.0, %v159_v53  ;;  %v342_v61 = vsel %vm162_vm10, 1.0, %v434_v55  ;;  %v169_v62 = vsub.f32 %v163_v57, %v341_v58  ;;  %v305_v2 = vsub.f32 %v299_v52, %v347_v56 }
 0x322   :  { %v170_v63 = vsub.f32 %v164_v60, %v342_v61  ;;  %v306_v5 = vsub.f32 %v300_v54, %v348_v59  ;;  %v171_v10 = vmul.f32 %v163_v57, %v473_v3  ;;  %v172_v11 = vmul.f32 %v164_v60, %v475_v4 }
 0x323   :  { %v173_v6 = vmul.f32 %v169_v62, %v473_v3  ;;  %v309_v8 = vmul.f32 %v305_v2, %v467_v0  ;;  %v307_v13 = vmul.f32 %v299_v52, %v467_v0  ;;  %v308_v15 = vmul.f32 %v300_v54, %v469_v1 }
 0x324   :  { %v174_v7 = vmul.f32 %v170_v63, %v475_v4  ;;  %v310_v9 = vmul.f32 %v306_v5, %v469_v1 }
 0x325   :  { %v175_v12 = vrot.slane %v173_v6, 4  ;;  %v311_v16 = vrot.slane %v309_v8, 4 }
 0x326   :  { %v176_v14 = vrot.slane %v174_v7, 4  ;;  %v312_v17 = vrot.slane %v310_v9, 4 }
 0x327   :  { %v177_v18 = vadd.f32 %v175_v12, %v171_v10  ;;  %v313_v20 = vadd.f32 %v311_v16, %v307_v13 }
 0x328   :  { %v178_v19 = vadd.f32 %v176_v14, %v172_v11  ;;  %v314_v3 = vadd.f32 %v312_v17, %v308_v15 }
 0x329   :  { %179 = vst [vmem:[#allocation5] sm:$0xff] %v177_v18 }
 0x32a   :  { %180 = vst [vmem:[#allocation5 + $0x8] sm:$0xff] %v178_v19 }
 0x32b   :  { %316 = vst [vmem:[#allocation5 + $0x10] sm:$0xff] %v313_v20 }
 0x32c   :  { %317 = vst [vmem:[#allocation5 + $0x18] sm:$0xff] %v314_v3 }
 0x32d   :  { %330 = dma.vmem_to_hbm [thread:$0]  %s323_s25, 512, %s325_s28, [#allocation4], %s431_s20, %s431_s20, %s432_s21  }
 0x32e   :  { %428 = dma.done.wait [#allocation4], 512  }
 0x32f   :  { %429 = vsyncadd [#allocation4], 4294966784 }
 0x330   :  { %335 = vsyncpa [#allocation3], 1 }
 0x331   :  { %336 = vsyncpa [#allocation4], 1 }

</bundles_post_ra>
